<compile_context>
chip_gen: v7x
topology: tpu7x:2x2x1
jax: 0.10.0
libtpu: 0.0.40
codegen_flags: <defaults>
</compile_context>

<pallas_src>
import functools

import jax
import jax.numpy as jnp
from jax.experimental import pallas as pl
from jax.experimental.pallas import tpu as pltpu

_LANE = 128


def _round_up(n, m):
    return ((n + m - 1) // m) * m


def _choose_tile(batch, block_b):
    """Lane-aligned batch tile <= block_b, preferring >= 2 grid steps."""
    half = _round_up(max(1, -(-batch // 2)), _LANE)          # ceil(B/2), lane-aligned
    return max(_LANE, min(_round_up(block_b, _LANE), half))


def _control_nn_kernel(x_ref, w2_ref, vec_ref, o_ref, *, l1, l2):
    """One batch tile.

    x_ref:   (2, TB)        input features, batch on the lane axis
    w2_ref:  (l2, l1)       folded fc2 weight (0.25 * w2), MXU LHS
    vec_ref: (max(l1,l2),6) folded per-feature vectors [w1a, w1b, b1, b2, w3, b3]
    o_ref:   (1, TB)        lane-dense output row
    """
    x = x_ref[...]                                   # (2, TB) f32
    v = vec_ref[...]
    w1a = v[:l1, 0:1]                                # (l1, 1)
    w1b = v[:l1, 1:2]                                # (l1, 1)
    b1 = v[:l1, 2:3]                                 # (l1, 1)
    b2 = v[:l2, 3:4]                                 # (l2, 1)
    w3 = v[:l2, 4:5]                                 # (l2, 1)
    b3 = v[0:1, 5:6]                                 # (1, 1)

    # fc1 + sigmoid (folded into a single tanh): VPU broadcast-FMAs, K=2.
    h1 = jnp.tanh(w1a * x[0:1, :] + w1b * x[1:2, :] + b1)                 # (l1, TB)

    # fc2 + sigmoid (folded into a single tanh): MXU matmul, f32 accumulation.
    h2 = jnp.tanh(
        jnp.dot(w2_ref[...], h1, preferred_element_type=jnp.float32) + b2)  # (l2, TB)

    # fc3 + tanh: VPU multiply + XLU cross-sublane reduce -> lane-dense (1, TB).
    o_ref[...] = jnp.tanh(jnp.sum(w3 * h2, axis=0, keepdims=True) + b3)


def pack_params(params):
    """Fold sigmoid->tanh constants; return (w2_folded, vector_slab) in f32.

    sigmoid(z) = 0.5*tanh(z/2) + 0.5, folded through all three layers:
      h1 = tanh(0.5*w1 @ x + 0.5*b1)
      h2 = tanh(0.25*w2 @ h1 + 0.5*b2 + 0.25*rowsum(w2))
      y  = tanh(0.5*w3 @ h2 + b3 + 0.5*rowsum(w3))
    """
    w1, b1, w2, b2, w3, b3 = (jnp.asarray(a, jnp.float32) for a in params)
    l1, l2 = w1.shape[0], w2.shape[0]

    w1f = 0.5 * w1                                      # (l1, 2)
    b1f = 0.5 * b1                                      # (l1,)
    w2f = 0.25 * w2                                     # (l2, l1)  MXU weight
    b2f = 0.5 * b2 + 0.25 * jnp.sum(w2, axis=1)         # (l2,)
    w3f = 0.5 * w3[0, :]                                # (l2,)
    b3f = b3[0] + 0.5 * jnp.sum(w3)                     # scalar

    rows = max(l1, l2)
    vec = jnp.zeros((rows, 6), jnp.float32)
    vec = vec.at[:l1, 0].set(w1f[:, 0])
    vec = vec.at[:l1, 1].set(w1f[:, 1])
    vec = vec.at[:l1, 2].set(b1f)
    vec = vec.at[:l2, 3].set(b2f)
    vec = vec.at[:l2, 4].set(w3f)
    vec = vec.at[0, 5].set(b3f)
    return w2f, vec


def control_nn_forward(x, params, *, block_b=32768):
    """Fused MLP forward.  x: (B, 2) -> (B, 1), matching the PyTorch module."""
    w1, _, w2, _, _, _ = params
    l1, l2 = w1.shape[0], w2.shape[0]
    B = x.shape[0]

    tb = _choose_tile(B, block_b)
    b_pad = _round_up(B, tb)

    # Single fused pad + transpose to a (2, b_pad) lane-dense layout (padded
    # columns are zero and discarded after the call).
    xt = jnp.pad(jnp.asarray(x, jnp.float32), ((0, b_pad - B), (0, 0))).T

    w2f, vec = pack_params(params)

    # VMEM budget: double-buffered x/out tiles + (l1+l2)*tb f32 temporaries
    # + small resident params, with 2x headroom; bounded to [16, 32] MiB so it
    # raises v5e's 16 MiB scoped default when needed and stays v7x-safe.
    est = 2 * 3 * 4 * tb + (l1 + l2 + 8) * 4 * tb + (1 << 20)
    vmem_limit = int(min(32 << 20, max(16 << 20, 2 * est)))

    out = pl.pallas_call(
        functools.partial(_control_nn_kernel, l1=l1, l2=l2),
        out_shape=jax.ShapeDtypeStruct((1, b_pad), jnp.float32),
        grid=(b_pad // tb,),
        in_specs=[
            pl.BlockSpec((2, tb), lambda i: (0, i)),        # batch-tiled input
            pl.BlockSpec(w2f.shape, lambda i: (0, 0)),      # resident fc2 weight
            pl.BlockSpec(vec.shape, lambda i: (0, 0)),      # resident small vectors
        ],
        out_specs=pl.BlockSpec((1, tb), lambda i: (0, i)),  # lane-dense output row
        compiler_params=pltpu.CompilerParams(
            dimension_semantics=("parallel",),
            vmem_limit_bytes=vmem_limit),
    )(xt, w2f, vec)

    return out[0, :B].reshape(B, 1)


def init_params(key, layer_1_size=16, layer_2_size=16):
    """PyTorch-style init; weights kept in PyTorch (out_features, in_features) order."""
    def linear(key, fan_in, fan_out):
        kw, kb = jax.random.split(key)
        bound = 1.0 / jnp.sqrt(jnp.float32(fan_in))
        w = jax.random.uniform(kw, (fan_out, fan_in), jnp.float32, -bound, bound)
        b = jax.random.uniform(kb, (fan_out,), jnp.float32, -bound, bound)
        return w, b

    k1, k2, k3 = jax.random.split(key, 3)
    w1, b1 = linear(k1, 2, layer_1_size)
    w2, b2 = linear(k2, layer_1_size, layer_2_size)
    w3, b3 = linear(k3, layer_2_size, 1)
    return (w1, b1, w2, b2, w3, b3)


def reference_forward(x, params):
    """Pure-JAX reference with the original PyTorch semantics (unfolded sigmoids)."""
    w1, b1, w2, b2, w3, b3 = params
    h = jax.nn.sigmoid(x @ w1.T + b1)
    h = jax.nn.sigmoid(h @ w2.T + b2)
    return jnp.tanh(h @ w3.T + b3)


if __name__ == "__main__":
    key = jax.random.PRNGKey(0)
    k_params, k_x1, k_x2 = jax.random.split(key, 3)

    params = init_params(k_params, layer_1_size=16, layer_2_size=16)

    # Small demo batch (same shape contract as the PyTorch module: (B, 2)).
    x_small = jax.random.normal(k_x1, (8, 2), dtype=jnp.float32)
    out_small = jax.block_until_ready(control_nn_forward(x_small, params))
    ref_small = reference_forward(x_small, params)
    assert out_small.shape == (8, 1), out_small.shape
    assert jnp.allclose(out_small, ref_small, atol=1e-4, rtol=1e-4)

    # Larger ragged batch: exercises the 2-step "parallel" grid and tail padding.
    x_big = jax.random.normal(k_x2, (1000, 2), dtype=jnp.float32)
    out_big = jax.block_until_ready(control_nn_forward(x_big, params))
    ref_big = reference_forward(x_big, params)
    assert out_big.shape == (1000, 1), out_big.shape
    assert jnp.allclose(out_big, ref_big, atol=1e-4, rtol=1e-4)

    print("KERNEL_OK")
</pallas_src>

<mosaic_0001>
module attributes {stable_mosaic.version = 11 : i64} {
  func.func @_control_nn_kernel(%arg0: i32, %arg1: memref<2x128xf32, #tpu.memory_space<vmem>>, %arg2: memref<16x16xf32, #tpu.memory_space<vmem>>, %arg3: memref<16x6xf32, #tpu.memory_space<vmem>>, %arg4: memref<1x128xf32, #tpu.memory_space<vmem>>) attributes {dimension_semantics = [#tpu.dimension_semantics<parallel>], iteration_bounds = array<i64: 1>, scalar_prefetch = 0 : i64, scratch_operands = 0 : i64, tpu.core_type = #tpu.core_type<tc>, window_params = [{transform_indices = @transform_0, window_bounds = array<i64: 2, 128>}, {pipeline_mode = #tpu.pipeline_mode<synchronous>, transform_indices = @transform_1, window_bounds = array<i64: 16, 16>}, {pipeline_mode = #tpu.pipeline_mode<synchronous>, transform_indices = @transform_2, window_bounds = array<i64: 16, 6>}, {transform_indices = @transform_3, window_bounds = array<i64: 1, 128>}]} {
    %c0 = arith.constant 0 : index
    %c0_0 = arith.constant 0 : index
    %0 = vector.load %arg1[%c0, %c0_0] : memref<2x128xf32, #tpu.memory_space<vmem>>, vector<2x128xf32>
    %c0_1 = arith.constant 0 : index
    %c0_2 = arith.constant 0 : index
    %1 = vector.load %arg3[%c0_1, %c0_2] : memref<16x6xf32, #tpu.memory_space<vmem>>, vector<16x6xf32>
    %2 = vector.extract_strided_slice %1 {offsets = [0, 0], sizes = [16, 1], strides = [1, 1]} : vector<16x6xf32> to vector<16x1xf32>
    %3 = vector.extract_strided_slice %1 {offsets = [0, 1], sizes = [16, 1], strides = [1, 1]} : vector<16x6xf32> to vector<16x1xf32>
    %4 = vector.extract_strided_slice %1 {offsets = [0, 2], sizes = [16, 1], strides = [1, 1]} : vector<16x6xf32> to vector<16x1xf32>
    %5 = vector.extract_strided_slice %1 {offsets = [0, 3], sizes = [16, 1], strides = [1, 1]} : vector<16x6xf32> to vector<16x1xf32>
    %6 = vector.extract_strided_slice %1 {offsets = [0, 4], sizes = [16, 1], strides = [1, 1]} : vector<16x6xf32> to vector<16x1xf32>
    %7 = vector.extract_strided_slice %1 {offsets = [0, 5], sizes = [1, 1], strides = [1, 1]} : vector<16x6xf32> to vector<1x1xf32>
    %8 = vector.extract_strided_slice %0 {offsets = [0, 0], sizes = [1, 128], strides = [1, 1]} : vector<2x128xf32> to vector<1x128xf32>
    %9 = vector.broadcast %2 : vector<16x1xf32> to vector<16x128xf32>
    %10 = vector.broadcast %8 : vector<1x128xf32> to vector<16x128xf32>
    %11 = arith.mulf %9, %10 : vector<16x128xf32>
    %12 = vector.extract_strided_slice %0 {offsets = [1, 0], sizes = [1, 128], strides = [1, 1]} : vector<2x128xf32> to vector<1x128xf32>
    %13 = vector.broadcast %3 : vector<16x1xf32> to vector<16x128xf32>
    %14 = vector.broadcast %12 : vector<1x128xf32> to vector<16x128xf32>
    %15 = arith.mulf %13, %14 : vector<16x128xf32>
    %16 = arith.addf %11, %15 : vector<16x128xf32>
    %17 = vector.broadcast %4 : vector<16x1xf32> to vector<16x128xf32>
    %18 = arith.addf %16, %17 : vector<16x128xf32>
    %19 = math.tanh %18 : vector<16x128xf32>
    %c0_3 = arith.constant 0 : index
    %c0_4 = arith.constant 0 : index
    %20 = vector.load %arg2[%c0_3, %c0_4] : memref<16x16xf32, #tpu.memory_space<vmem>>, vector<16x16xf32>
    %cst = arith.constant dense<0.000000e+00> : vector<16x128xf32>
    %21 = tpu.matmul %20, %19, %cst {dimension_numbers = #tpu.dot_dimension_numbers<[1], [0], [0], [1], [0, 0, 1, 1], [], []>} : vector<16x16xf32>, vector<16x128xf32>, vector<16x128xf32> -> vector<16x128xf32>
    %22 = vector.broadcast %5 : vector<16x1xf32> to vector<16x128xf32>
    %23 = arith.addf %21, %22 : vector<16x128xf32>
    %24 = math.tanh %23 : vector<16x128xf32>
    %25 = vector.broadcast %6 : vector<16x1xf32> to vector<16x128xf32>
    %26 = arith.mulf %25, %24 : vector<16x128xf32>
    %cst_5 = arith.constant dense<0.000000e+00> : vector<128xf32>
    %27 = vector.multi_reduction <add>, %26, %cst_5 [0] : vector<16x128xf32> to vector<128xf32>
    %28 = vector.shape_cast %27 : vector<128xf32> to vector<1x128xf32>
    %29 = vector.broadcast %7 : vector<1x1xf32> to vector<1x128xf32>
    %30 = arith.addf %28, %29 : vector<1x128xf32>
    %31 = math.tanh %30 : vector<1x128xf32>
    %c0_6 = arith.constant 0 : index
    %c0_7 = arith.constant 0 : index
    %32 = vector.load %arg4[%c0_6, %c0_7] : memref<1x128xf32, #tpu.memory_space<vmem>>, vector<1x128xf32>
    tpu.vector_store %arg4[%c0_6, %c0_7], %31 {strides = array<i32>} : memref<1x128xf32, #tpu.memory_space<vmem>>, vector<1x128xf32>,
    return
  }
  func.func @transform_0(%arg0: i32) -> (i32, i32) {
    %c0_i32 = arith.constant 0 : i32
    %c0_i32_0 = arith.constant 0 : i32
    return %c0_i32, %arg0 : i32, i32
  }
  func.func @transform_1(%arg0: i32) -> (i32, i32) {
    %c0_i32 = arith.constant 0 : i32
    %c0_i32_0 = arith.constant 0 : i32
    %c0_i32_1 = arith.constant 0 : i32
    return %c0_i32, %c0_i32_0 : i32, i32
  }
  func.func @transform_2(%arg0: i32) -> (i32, i32) {
    %c0_i32 = arith.constant 0 : i32
    %c0_i32_0 = arith.constant 0 : i32
    %c0_i32_1 = arith.constant 0 : i32
    return %c0_i32, %c0_i32_0 : i32, i32
  }
  func.func @transform_3(%arg0: i32) -> (i32, i32) {
    %c0_i32 = arith.constant 0 : i32
    %c0_i32_0 = arith.constant 0 : i32
    return %c0_i32, %arg0 : i32, i32
  }
}

</mosaic_0001>

<bundles_post_ra>
// kernel: tpu_custom_call.1
= control target key start
LH: loop header
LB: loop body
LE: loop exit
PB: predicated region body
PF: predicated region fallthrough
CT: control target
= control target key end

     0   :  { %v260_v1 = vmov 1   ;;  %v261_v2 = vmov 0   ;;  %s316_s0 = inlined_call_operand.vmem [shape: f32[2,128], index: 0, kind: input, shape index: {}]   ;;  %s317_s1 = inlined_call_operand.vmem [shape: f32[16,16], index: 1, kind: input, shape index: {}]   ;;  %s318_s2 = inlined_call_operand.vmem [shape: f32[16,6], index: 2, kind: input, shape index: {}]   ;;  %s319_s3 = inlined_call_operand.hbm [shape: f32[1,128], index: 3, kind: output, shape index: {}]  }
   0x1   :  { %v16_v0 = vld [vmem:[%s318_s2] sm:$0xff]  ;;  %219 = vset.pattern.permute.xlu1 %v260_v1  ;;  %218 = vset.pattern.permute.xlu0 %v261_v2 }
   0x2   :  { %8 = vsyncpa [#allocation3], 0  ;;  %35 = vperm.xlu1 %219, %v16_v0   ;;  %20 = vperm.xlu0 %218, %v16_v0   ;;  %v17_v3 = vld [vmem:[%s318_s2 + $0x8] sm:$0xff]  ;;  %v262_v4 = vmov 2   ;;  %v62_v5 = vld [vmem:[%s317_s1] sm:$0xff]  ;;  %vm72_vm0 = vcmask 130048   ;;  %v28_v9 = vlaneseq }
   0x3   :  { %204 = vmatprep.mubr.msk.f32.mxu0 %vm72_vm0, %v62_v5  ;;  %v263_v6 = vmov 3   ;;  %v264_v7 = vmov 4   ;;  %v265_v8 = vmov 5   ;;  %v15_v13 = vld [vmem:[%s316_s0] sm:$0x3]  ;;  %v63_v33 = vld [vmem:[%s317_s1 + $0x8] sm:$0xff] }
   0x4   :  { %v29_v10 = vshrl.u32 %v28_v9, 7  ;;  %s266_s1 = smov [#allocation2]  }
   0x5   :  { %s186_s20 = sshll.u32 %s266_s1, 4  ;;  %s187_s20 = int_to_ptr.vmem [resolvable:$true] %s186_s20 }
   0x6   :  { %39 = vperm.xlu1 %219, %v17_v3   ;;  %25 = vperm.xlu0 %218, %v17_v3   ;;  %v44_v11 = vsub.s32 1, %v29_v10  ;;  %v30_v12 = vsub.s32 0, %v29_v10  ;;  %s236_s21 = scalar_lea.vmem %s187_s20, 16  ;;  %s240_s22 = scalar_lea.vmem %s187_s20, 32 }
   0x7   :  { %p237_p0 = scmp.ne.s32.totalorder %s187_s20, %s236_s21  ;;  %p241_p1 = scmp.lt.s32.totalorder %s187_s20, %s187_s20 }
   0x8   :  { %v45_v15 = vrot.slane %v15_v13, %v44_v11  ;;  %v31_v17 = vrot.slane %v15_v13, %v30_v12  ;;  %p242_p2 = scmp.lt.s32.totalorder %s240_s22, %s236_s21 }
   0xa   :  { %221 = vset.pattern.permute.xlu1 %v262_v4  ;;  %220 = vset.pattern.permute.xlu0 %v262_v4  ;;  %p243_p3 = por %p242_p2, %p241_p1 }
   0xb   :  { %55 = vperm.xlu1 %221, %v17_v3   ;;  %51 = vperm.xlu0 %220, %v16_v0  }
   0xc   :  { %p244_p4 = pnand %p243_p3, %p237_p0 }
   0xf   :  { %223 = vset.pattern.permute.xlu0 %v263_v6  ;;  %222 = vset.pattern.permute.xlu1 %v263_v6 }
  0x10   :  { %69 = vperm.xlu0 %223, %v17_v3   ;;  %65 = vperm.xlu1 %222, %v16_v0  }
  0x14   :  { %224 = vset.pattern.permute.xlu1 %v264_v7  ;;  %225 = vset.pattern.permute.xlu0 %v265_v8 }
  0x15   :  { %157 = vperm.xlu1 %224, %v16_v0   ;;  %174 = vperm.xlu0 %225, %v16_v0  }
  0x19   :  { %161 = vperm.xlu1 %224, %v17_v3  }
  0x81   :  { %v36_v14 = vpop.permute.xlu1 %35  ;;  %v21_v16 = vpop.permute.xlu0 %20 }
  0x82   :  { %v46_v18 = vmul.f32 %v45_v15, %v36_v14  ;;  %v32_v19 = vmul.f32 %v31_v17, %v21_v16 }
  0x84   :  { %v48_v25 = vadd.f32 %v46_v18, %v32_v19 }
  0x85   :  { %v40_v20 = vpop.permute.xlu1 %39  ;;  %v26_v21 = vpop.permute.xlu0 %25 }
  0x86   :  { %v47_v22 = vmul.f32 %v45_v15, %v40_v20  ;;  %v33_v23 = vmul.f32 %v31_v17, %v26_v21 }
  0x88   :  { %v49_v24 = vadd.f32 %v47_v22, %v33_v23 }
  0x8a   :  { %v56_v26 = vpop.permute.xlu1 %55  ;;  %v52_v27 = vpop.permute.xlu0 %51 }
  0x8b   :  { %v59_v28 = vadd.f32 %v56_v26, %v49_v24  ;;  %v58_v29 = vadd.f32 %v52_v27, %v48_v25 }
  0x8d   :  { %226 = vtanh.f32 %v59_v28 }
  0x8e   :  { %228 = vtanh.f32 %v58_v29 }
  0x8f   :  { %v70_v34 = vpop.permute.xlu0 %69  ;;  %v66_v35 = vpop.permute.xlu1 %65 }
  0x94   :  { %v158_v40 = vpop.permute.xlu1 %157  ;;  %v175_v52 = vpop.permute.xlu0 %174 }
  0x97   :  { %v227_v30 = vpop.eup %226 }
  0x98   :  { %v229_v31 = vpop.eup %228  ;;  %v162_v42 = vpop.permute.xlu1 %161 }
  0x99   :  { %v207_v32 = vpack.c.bf16 %v227_v30, %v229_v31 }
  0x9b   :  { %208 = vmatprep.subr.bf16.mxu0 %v207_v32 }
  0x9c   :  { %210 = vmatpush3.bf16.msra.mxu0 %v207_v32 }
  0x9f   :  { %205 = vmatmul.mubr.msk.f32.vlgmr.msra.gmra.mrb[0].mxu0 %vm72_vm0, %v63_v33 }
 0x172   :  { %v206_v36 = vpop.f32.mrb[0].mxu0 }
 0x173   :  { %v151_v37 = vadd.f32 %v206_v36, %v70_v34  ;;  %v145_v38 = vpop.f32.mrb[1].mxu0 }
 0x174   :  { %v146_v39 = vadd.f32 %v145_v38, %v66_v35 }
 0x175   :  { %230 = vtanh.f32 %v151_v37 }
 0x176   :  { %232 = vtanh.f32 %v146_v39 }
 0x17f   :  { %v231_v41 = vpop.eup %230 }
 0x180   :  { %v233_v43 = vpop.eup %232  ;;  %v165_v44 = vmul.f32 %v231_v41, %v162_v42 }
 0x181   :  { %v164_v45 = vmul.f32 %v233_v43, %v158_v40 }
 0x183   :  { %v166_v46 = vadd.f32 %v165_v44, %v164_v45 }
 0x185   :  { %v167_v47 = vrot.slane %v166_v46, 4 }
 0x187   :  { %v168_v48 = vadd.f32 %v167_v47, %v166_v46 }
 0x189   :  { %v169_v49 = vrot.slane %v168_v48, 2 }
 0x18b   :  { %v170_v50 = vadd.f32 %v169_v49, %v168_v48 }
 0x18d   :  { %v171_v51 = vrot.slane %v170_v50, 1 }
 0x18f   :  { %v172_v53 = vadd.f32 %v171_v51, %v170_v50 }
 0x191   :  { %v177_v54 = vadd.f32 %v175_v52, %v172_v53 }
 0x193   :  { %234 = vtanh.f32 %v177_v54 }
 0x19d   :  { %v235_v55 = vpop.eup %234 }
 0x19e   :  { %179 = vst [vmem:[#allocation2] sm:$0x1] %v235_v55 }
 0x19f   :  { %247 = shalt.err (!%p244_p4)
}
 0x1a0   :  { %s248_s25 = scalar_lea.hbm %s319_s3, 16 }
 0x1a1   :  { %p249_p5 = scmp.ne.s32.totalorder %s319_s3, %s248_s25  ;;  %p252_p6 = scmp.lt.u32.totalorder %s248_s25, %s319_s3 }
 0x1a3   :  { %p254_p7 = pnand %p252_p6, %p249_p5 }
 0x1a5   :  { %257 = shalt.err (!%p254_p7)
}
 0x1a6   :  { %189 = dma.vmem_to_hbm [thread:$0]  %s187_s20, 16, %s319_s3, [#allocation3]  }
 0x1a7   :  { %258 = dma.done.wait [#allocation3], 16  }
 0x1a8   :  { %259 = vsyncadd [#allocation3], 4294967280 }
 0x1a9   :  { %193 = vsyncpa [#allocation3], 1 }

</bundles_post_ra>
